<compile_context>
chip_gen: v7x
topology: tpu7x:2x2x1
jax: 0.10.0
libtpu: 0.0.40
codegen_flags: <defaults>
</compile_context>

<pallas_src>
import functools

import jax
import jax.numpy as jnp
from jax import lax
from jax.experimental import pallas as pl
from jax.experimental.pallas import tpu as pltpu


# ----------------------------------------------------------------------------
# Fused kernel: pooled sum (VPU chunk accumulation) + tiny MLP + rescale, 1 pass
# ----------------------------------------------------------------------------
def _fused_ca_kernel(x_ref, w1_ref, b1_ref, w2_ref, b2_ref, o_ref, *, inv_hw):
    # x_ref: (1, C, HWp)  w1: (4, C)  b1: (4, 1)  w2: (C, 4)  b2: (C, 1)  o: (1, C, HWp)
    C = x_ref.shape[1]
    hwp = x_ref.shape[2]
    nchunk = hwp // 128

    # Per-channel sum: accumulate 128-lane chunks into a (C, 128) f32 carry on the VPU,
    # lane-reduce ONCE at the end (keeps the hot loop off the XLU, no full-tile upcast).
    def body(i, acc):
        off = pl.multiple_of(i * 128, 128)
        return acc + x_ref[0, :, pl.ds(off, 128)].astype(jnp.float32)

    part = lax.fori_loop(0, nchunk, body, jnp.zeros((C, 128), jnp.float32))
    pooled = jnp.sum(part, axis=1, keepdims=True) * inv_hw                 # (C, 1) mean

    # conv_du[0]: 1x1 conv C -> 4 (+bias), LeakyReLU(0.1)
    y1 = jnp.dot(w1_ref[...].astype(jnp.float32), pooled,
                 preferred_element_type=jnp.float32) + b1_ref[...]          # (4, 1)
    y1 = jnp.where(y1 > 0, y1, 0.1 * y1)
    # conv_du[2]: 1x1 conv 4 -> C (+bias), Sigmoid
    y2 = jnp.dot(w2_ref[...].astype(jnp.float32), y1,
                 preferred_element_type=jnp.float32) + b2_ref[...]          # (C, 1)
    scale = 1.0 / (1.0 + jnp.exp(-y2))                                      # (C, 1) f32

    # Channel-wise rescale (lane-broadcast of scale); data already VMEM-resident.
    o_ref[0] = (x_ref[0] * scale).astype(o_ref.dtype)


# ----------------------------------------------------------------------------
# Two-pass fallback, Pass 1: tiled pooled sum + MLP (phase-gated on last tile)
# ----------------------------------------------------------------------------
def _pool_scale_kernel(x_ref, w1_ref, b1_ref, w2_ref, b2_ref, scale_ref, acc_ref,
                       *, inv_hw):
    # x_ref: (1, C, thw)   scale_ref: (1, C, 1) f32   acc_ref: (C, 128) f32 scratch
    t = pl.program_id(1)
    C = x_ref.shape[1]
    thw = x_ref.shape[2]
    nchunk = thw // 128

    @pl.when(t == 0)
    def _init():
        acc_ref[...] = jnp.zeros_like(acc_ref)

    def body(i, acc):
        off = pl.multiple_of(i * 128, 128)
        return acc + x_ref[0, :, pl.ds(off, 128)].astype(jnp.float32)

    acc_ref[...] += lax.fori_loop(0, nchunk, body, jnp.zeros((C, 128), jnp.float32))

    @pl.when(t == pl.num_programs(1) - 1)
    def _finalize():
        pooled = jnp.sum(acc_ref[...], axis=1, keepdims=True) * inv_hw      # (C, 1)
        y1 = jnp.dot(w1_ref[...].astype(jnp.float32), pooled,
                     preferred_element_type=jnp.float32) + b1_ref[...]
        y1 = jnp.where(y1 > 0, y1, 0.1 * y1)
        y2 = jnp.dot(w2_ref[...].astype(jnp.float32), y1,
                     preferred_element_type=jnp.float32) + b2_ref[...]
        scale_ref[0] = 1.0 / (1.0 + jnp.exp(-y2))                            # (C, 1) f32


# ----------------------------------------------------------------------------
# Two-pass fallback, Pass 2: streaming channel-wise rescale
# ----------------------------------------------------------------------------
def _apply_scale_kernel(x_ref, scale_ref, o_ref):
    # x_ref: (1, C, thw)   scale_ref: (1, C, 1) f32   o_ref: (1, C, thw)
    o_ref[...] = (x_ref[...] * scale_ref[...]).astype(o_ref.dtype)


# ----------------------------------------------------------------------------
# Sizing helpers (generation-aware)
# ----------------------------------------------------------------------------
def _vmem_capacity_bytes():
    try:
        return int(pltpu.get_tpu_info().vmem_capacity_bytes)
    except Exception:
        return 64 * 1024 * 1024  # conservative (v7x)


def _choose_hw_tile(hwp, c, itemsize, max_tile_bytes):
    """Largest multiple-of-128 divisor of hwp with c*thw*itemsize <= max_tile_bytes."""
    assert hwp % 128 == 0
    d = hwp // 128
    max_lanes = max(128, max_tile_bytes // max(1, c * itemsize))
    best = 128
    for k in range(1, d + 1):
        if d % k == 0 and 128 * k <= max_lanes:
            best = 128 * k
    return best


# ----------------------------------------------------------------------------
# Wrapper
# ----------------------------------------------------------------------------
def ca_layer(x, w1, b1, w2, b2, hw_tile=None):
    """x: (N, C, H, W).  w1: (4, C), b1: (4,), w2: (C, 4), b2: (C,).

    Passing hw_tile forces the two-pass (tiled) fallback path.
    """
    N, C, H, W = x.shape
    HW = H * W
    itemsize = jnp.dtype(x.dtype).itemsize

    # NCHW -> (N, C, HW): pure reshape.  Pad HW up to a multiple of 128 so every
    # store is lane-aligned / unmasked; the mean divides by the true HW.
    HWp = ((HW + 127) // 128) * 128
    x_l = x.reshape(N, C, HW)
    if HWp != HW:
        x_l = jnp.pad(x_l, ((0, 0), (0, 0), (0, HWp - HW)))

    b1_c = b1.reshape(4, 1)
    b2_c = b2.reshape(C, 1)
    inv_hw = 1.0 / float(HW)

    # Generation-aware VMEM budgets (128 MiB on v5e/v6e, 64 MiB on v7x).
    vmem_cap = _vmem_capacity_bytes()
    vmem_limit = max(32 * 2**20, min((vmem_cap * 3) // 4, 96 * 2**20))

    slab_bytes = C * HWp * itemsize
    # Fused working set ~ 2x input slab + 2x output slab (double-buffered over N).
    fused_ok = (hw_tile is None) and (4 * slab_bytes + (2 << 20) <= vmem_limit)

    if fused_ok:
        out = pl.pallas_call(
            functools.partial(_fused_ca_kernel, inv_hw=inv_hw),
            out_shape=jax.ShapeDtypeStruct((N, C, HWp), x.dtype),
            grid_spec=pltpu.PrefetchScalarGridSpec(
                num_scalar_prefetch=0,
                grid=(N,),
                in_specs=[
                    pl.BlockSpec((1, C, HWp), lambda n: (n, 0, 0)),
                    pl.BlockSpec((4, C), lambda n: (0, 0)),
                    pl.BlockSpec((4, 1), lambda n: (0, 0)),
                    pl.BlockSpec((C, 4), lambda n: (0, 0)),
                    pl.BlockSpec((C, 1), lambda n: (0, 0)),
                ],
                out_specs=pl.BlockSpec((1, C, HWp), lambda n: (n, 0, 0)),
            ),
            compiler_params=pltpu.CompilerParams(
                dimension_semantics=("parallel",),
                vmem_limit_bytes=vmem_limit),
        )(x_l, w1, b1_c, w2, b2_c)
    else:
        # --------------------- two-pass fallback ---------------------
        # Pass-2 working set ~ 2x input tile + 2x output tile; keep tiles 4-8 MiB.
        tile_budget = max(128 * C * itemsize,
                          min(8 * 2**20, (vmem_limit - (2 << 20)) // 8))
        if hw_tile is None:
            hw_tile = _choose_hw_tile(HWp, C, itemsize, tile_budget)
        assert HWp % hw_tile == 0 and hw_tile % 128 == 0, \
            "hw_tile must divide padded H*W and be a multiple of 128"
        num_t = HWp // hw_tile

        # Pass 1: per-image, per-channel sigmoid scale (N, C, 1) in f32.
        scales = pl.pallas_call(
            functools.partial(_pool_scale_kernel, inv_hw=inv_hw),
            out_shape=jax.ShapeDtypeStruct((N, C, 1), jnp.float32),
            grid_spec=pltpu.PrefetchScalarGridSpec(
                num_scalar_prefetch=0,
                grid=(N, num_t),
                in_specs=[
                    pl.BlockSpec((1, C, hw_tile), lambda n, t: (n, 0, t)),
                    pl.BlockSpec((4, C), lambda n, t: (0, 0)),
                    pl.BlockSpec((4, 1), lambda n, t: (0, 0)),
                    pl.BlockSpec((C, 4), lambda n, t: (0, 0)),
                    pl.BlockSpec((C, 1), lambda n, t: (0, 0)),
                ],
                out_specs=pl.BlockSpec((1, C, 1), lambda n, t: (n, 0, 0)),
                scratch_shapes=[pltpu.VMEM((C, 128), jnp.float32)],
            ),
            compiler_params=pltpu.CompilerParams(
                dimension_semantics=("parallel", "arbitrary"),
                vmem_limit_bytes=vmem_limit),
        )(x_l, w1, b1_c, w2, b2_c)

        # Pass 2: stream x through VMEM once and rescale; fully parallel grid.
        out = pl.pallas_call(
            _apply_scale_kernel,
            out_shape=jax.ShapeDtypeStruct((N, C, HWp), x.dtype),
            grid_spec=pltpu.PrefetchScalarGridSpec(
                num_scalar_prefetch=0,
                grid=(N, num_t),
                in_specs=[
                    pl.BlockSpec((1, C, hw_tile), lambda n, t: (n, 0, t)),
                    pl.BlockSpec((1, C, 1), lambda n, t: (n, 0, 0)),
                ],
                out_specs=pl.BlockSpec((1, C, hw_tile), lambda n, t: (n, 0, t)),
            ),
            compiler_params=pltpu.CompilerParams(
                dimension_semantics=("parallel", "parallel"),
                vmem_limit_bytes=vmem_limit),
        )(x_l, scales)

    if HWp != HW:
        out = out[:, :, :HW]
    return out.reshape(N, C, H, W)


def ca_layer_reference(x, w1, b1, w2, b2):
    """Pure-JAX NCHW reference matching the PyTorch CALayer."""
    pooled = jnp.mean(x, axis=(2, 3))                           # (N, C)
    y1 = pooled @ w1.T + b1                                     # (N, 4)
    y1 = jnp.where(y1 > 0, y1, 0.1 * y1)
    y2 = y1 @ w2.T + b2                                         # (N, C)
    scale = jax.nn.sigmoid(y2)
    return x * scale[:, :, None, None]


if __name__ == "__main__":
    N, C, H, W = 2, 4, 16, 16

    key = jax.random.PRNGKey(0)
    kx, kw1, kb1, kw2, kb2 = jax.random.split(key, 5)

    x = jax.random.normal(kx, (N, C, H, W), dtype=jnp.float32)

    # Conv2d(C,4,1) and Conv2d(4,C,1) parameters
    w1 = jax.random.normal(kw1, (4, C), dtype=jnp.float32) * 0.5
    b1 = jax.random.normal(kb1, (4,), dtype=jnp.float32) * 0.1
    w2 = jax.random.normal(kw2, (C, 4), dtype=jnp.float32) * 0.5
    b2 = jax.random.normal(kb2, (C,), dtype=jnp.float32) * 0.1

    ref = ca_layer_reference(x, w1, b1, w2, b2)

    # Default path: fused single-pass (image slab fits VMEM budget).
    out = jax.block_until_ready(ca_layer(x, w1, b1, w2, b2))
    assert out.shape == (N, C, H, W)
    assert jnp.allclose(out, ref, atol=1e-5, rtol=1e-5), "mismatch vs reference (fused)"

    # Explicit hw_tile forces the two-pass tiled fallback (exercises the accumulator).
    out2 = jax.block_until_ready(ca_layer(x, w1, b1, w2, b2, hw_tile=128))
    assert jnp.allclose(out2, ref, atol=1e-5, rtol=1e-5), "mismatch vs reference (tiled)"

    print("KERNEL_OK")
</pallas_src>

<mosaic_0001>
module attributes {stable_mosaic.version = 11 : i64} {
  func.func @_fused_ca_kernel(%arg0: i32, %arg1: memref<1x4x256xf32, #tpu.memory_space<vmem>>, %arg2: memref<4x4xf32, #tpu.memory_space<vmem>>, %arg3: memref<4x1xf32, #tpu.memory_space<vmem>>, %arg4: memref<4x4xf32, #tpu.memory_space<vmem>>, %arg5: memref<4x1xf32, #tpu.memory_space<vmem>>, %arg6: memref<1x4x256xf32, #tpu.memory_space<vmem>>) attributes {dimension_semantics = [#tpu.dimension_semantics<parallel>], iteration_bounds = array<i64: 2>, scalar_prefetch = 0 : i64, scratch_operands = 0 : i64, tpu.core_type = #tpu.core_type<tc>, window_params = [{transform_indices = @transform_0, window_bounds = array<i64: 1, 4, 256>}, {pipeline_mode = #tpu.pipeline_mode<synchronous>, transform_indices = @transform_1, window_bounds = array<i64: 4, 4>}, {pipeline_mode = #tpu.pipeline_mode<synchronous>, transform_indices = @transform_2, window_bounds = array<i64: 4, 1>}, {pipeline_mode = #tpu.pipeline_mode<synchronous>, transform_indices = @transform_3, window_bounds = array<i64: 4, 4>}, {pipeline_mode = #tpu.pipeline_mode<synchronous>, transform_indices = @transform_4, window_bounds = array<i64: 4, 1>}, {transform_indices = @transform_5, window_bounds = array<i64: 1, 4, 256>}]} {
    %cst = arith.constant 0.000000e+00 : f32
    %0 = vector.broadcast %cst : f32 to vector<4x128xf32>
    %c0_i32 = arith.constant 0 : i32
    %c2_i32 = arith.constant 2 : i32
    %1 = arith.addi %c0_i32, %c2_i32 : i32
    %c1_i32 = arith.constant 1 : i32
    %2 = scf.for %arg7 = %c0_i32 to %1 step %c1_i32 iter_args(%arg8 = %0) -> (vector<4x128xf32>)  : i32 {
      %c128_i32 = arith.constant 128 : i32
      %34 = arith.muli %arg7, %c128_i32 : i32
      %35 = tpu.assume_multiple %34, 128 : i32
      %c0_23 = arith.constant 0 : index
      %c0_24 = arith.constant 0 : index
      %36 = arith.index_cast %35 : i32 to index
      %37 = vector.load %arg1[%c0_23, %c0_24, %36] : memref<1x4x256xf32, #tpu.memory_space<vmem>>, vector<1x4x128xf32>
      %38 = vector.shape_cast %37 : vector<1x4x128xf32> to vector<4x128xf32>
      %39 = arith.addf %arg8, %38 : vector<4x128xf32>
      scf.yield %39 : vector<4x128xf32>
    }
    %c2_i32_0 = arith.constant 2 : i32
    %cst_1 = arith.constant dense<0.000000e+00> : vector<4xf32>
    %3 = vector.multi_reduction <add>, %2, %cst_1 [1] : vector<4x128xf32> to vector<4xf32>
    %4 = vector.shape_cast %3 : vector<4xf32> to vector<4x1xf32>
    %cst_2 = arith.constant 3.906250e-03 : f32
    %5 = vector.broadcast %cst_2 : f32 to vector<4x1xf32>
    %6 = arith.mulf %4, %5 : vector<4x1xf32>
    %c0 = arith.constant 0 : index
    %c0_3 = arith.constant 0 : index
    %7 = vector.load %arg2[%c0, %c0_3] : memref<4x4xf32, #tpu.memory_space<vmem>>, vector<4x4xf32>
    %cst_4 = arith.constant dense<0.000000e+00> : vector<4x1xf32>
    %8 = tpu.matmul %7, %6, %cst_4 {dimension_numbers = #tpu.dot_dimension_numbers<[1], [0], [0], [1], [0, 0, 1, 1], [], []>} : vector<4x4xf32>, vector<4x1xf32>, vector<4x1xf32> -> vector<4x1xf32>
    %c0_5 = arith.constant 0 : index
    %c0_6 = arith.constant 0 : index
    %9 = vector.load %arg3[%c0_5, %c0_6] : memref<4x1xf32, #tpu.memory_space<vmem>>, vector<4x1xf32>
    %10 = arith.addf %8, %9 : vector<4x1xf32>
    %cst_7 = arith.constant 0.000000e+00 : f32
    %11 = vector.broadcast %cst_7 : f32 to vector<4x1xf32>
    %12 = arith.cmpf ogt, %10, %11 : vector<4x1xf32>
    %cst_8 = arith.constant 1.000000e-01 : f32
    %13 = vector.broadcast %cst_8 : f32 to vector<4x1xf32>
    %14 = arith.mulf %13, %10 : vector<4x1xf32>
    %15 = arith.select %12, %10, %14 : vector<4x1xi1>, vector<4x1xf32>
    %c0_9 = arith.constant 0 : index
    %c0_10 = arith.constant 0 : index
    %16 = vector.load %arg4[%c0_9, %c0_10] : memref<4x4xf32, #tpu.memory_space<vmem>>, vector<4x4xf32>
    %cst_11 = arith.constant dense<0.000000e+00> : vector<4x1xf32>
    %17 = tpu.matmul %16, %15, %cst_11 {dimension_numbers = #tpu.dot_dimension_numbers<[1], [0], [0], [1], [0, 0, 1, 1], [], []>} : vector<4x4xf32>, vector<4x1xf32>, vector<4x1xf32> -> vector<4x1xf32>
    %c0_12 = arith.constant 0 : index
    %c0_13 = arith.constant 0 : index
    %18 = vector.load %arg5[%c0_12, %c0_13] : memref<4x1xf32, #tpu.memory_space<vmem>>, vector<4x1xf32>
    %19 = arith.addf %17, %18 : vector<4x1xf32>
    %cst_14 = arith.constant 0.000000e+00 : f32
    %20 = vector.broadcast %cst_14 : f32 to vector<4x1xf32>
    %21 = arith.subf %20, %19 : vector<4x1xf32>
    %22 = math.exp %21 : vector<4x1xf32>
    %cst_15 = arith.constant 1.000000e+00 : f32
    %23 = vector.broadcast %cst_15 : f32 to vector<4x1xf32>
    %24 = arith.addf %23, %22 : vector<4x1xf32>
    %cst_16 = arith.constant 1.000000e+00 : f32
    %25 = vector.broadcast %cst_16 : f32 to vector<4x1xf32>
    %26 = arith.divf %25, %24 : vector<4x1xf32>
    %c0_17 = arith.constant 0 : index
    %c0_18 = arith.constant 0 : index
    %c0_19 = arith.constant 0 : index
    %27 = vector.load %arg1[%c0_17, %c0_18, %c0_19] : memref<1x4x256xf32, #tpu.memory_space<vmem>>, vector<1x4x256xf32>
    %28 = vector.shape_cast %27 : vector<1x4x256xf32> to vector<4x256xf32>
    %29 = vector.broadcast %26 : vector<4x1xf32> to vector<4x256xf32>
    %30 = arith.mulf %28, %29 : vector<4x256xf32>
    %c0_20 = arith.constant 0 : index
    %c0_21 = arith.constant 0 : index
    %c0_22 = arith.constant 0 : index
    %31 = vector.load %arg6[%c0_20, %c0_21, %c0_22] : memref<1x4x256xf32, #tpu.memory_space<vmem>>, vector<1x4x256xf32>
    %32 = vector.shape_cast %31 : vector<1x4x256xf32> to vector<4x256xf32>
    %33 = vector.shape_cast %30 : vector<4x256xf32> to vector<1x4x256xf32>
    tpu.vector_store %arg6[%c0_20, %c0_21, %c0_22], %33 {strides = array<i32>} : memref<1x4x256xf32, #tpu.memory_space<vmem>>, vector<1x4x256xf32>,
    return
  }
  func.func @transform_0(%arg0: i32) -> (i32, i32, i32) {
    %c0_i32 = arith.constant 0 : i32
    %c0_i32_0 = arith.constant 0 : i32
    %c0_i32_1 = arith.constant 0 : i32
    return %arg0, %c0_i32, %c0_i32_0 : i32, i32, i32
  }
  func.func @transform_1(%arg0: i32) -> (i32, i32) {
    %c0_i32 = arith.constant 0 : i32
    %c0_i32_0 = arith.constant 0 : i32
    %c0_i32_1 = arith.constant 0 : i32
    return %c0_i32, %c0_i32_0 : i32, i32
  }
  func.func @transform_2(%arg0: i32) -> (i32, i32) {
    %c0_i32 = arith.constant 0 : i32
    %c0_i32_0 = arith.constant 0 : i32
    %c0_i32_1 = arith.constant 0 : i32
    return %c0_i32, %c0_i32_0 : i32, i32
  }
  func.func @transform_3(%arg0: i32) -> (i32, i32) {
    %c0_i32 = arith.constant 0 : i32
    %c0_i32_0 = arith.constant 0 : i32
    %c0_i32_1 = arith.constant 0 : i32
    return %c0_i32, %c0_i32_0 : i32, i32
  }
  func.func @transform_4(%arg0: i32) -> (i32, i32) {
    %c0_i32 = arith.constant 0 : i32
    %c0_i32_0 = arith.constant 0 : i32
    %c0_i32_1 = arith.constant 0 : i32
    return %c0_i32, %c0_i32_0 : i32, i32
  }
  func.func @transform_5(%arg0: i32) -> (i32, i32, i32) {
    %c0_i32 = arith.constant 0 : i32
    %c0_i32_0 = arith.constant 0 : i32
    %c0_i32_1 = arith.constant 0 : i32
    return %arg0, %c0_i32, %c0_i32_0 : i32, i32, i32
  }
}

</mosaic_0001>

<bundles_post_ra>
// kernel: tpu_custom_call.1
= control target key start
LH: loop header
LB: loop body
LE: loop exit
PB: predicated region body
PF: predicated region fallthrough
CT: control target
= control target key end

     0   :  { %10 = vsyncpa [#allocation3], 0  ;;  %s977_s0 = inlined_call_operand.hbm [shape: f32[2,4,256], index: 0, kind: input, shape index: {}]   ;;  %s978_s1 = inlined_call_operand.vmem [shape: f32[4,4], index: 1, kind: input, shape index: {}]   ;;  %s979_s2 = inlined_call_operand.vmem [shape: f32[4,1], index: 2, kind: input, shape index: {}]   ;;  %s980_s3 = inlined_call_operand.vmem [shape: f32[4,4], index: 3, kind: input, shape index: {}]   ;;  %s981_s4 = inlined_call_operand.vmem [shape: f32[4,1], index: 4, kind: input, shape index: {}]   ;;  %s982_s5 = inlined_call_operand.hbm [shape: f32[2,4,256], index: 5, kind: output, shape index: {}]  }
   0x1   :  { %12 = vsyncpa [#allocation3 + $0x1], 0 }
   0x2   :  { %13 = vsyncpa [#allocation4], 0 }
   0x3   :  { %15 = vsyncpa [#allocation4 + $0x1], 0  ;;  %s793_s18 = smov 0   ;;  %s795_s19 = smov 0  }
   0x4   :  { %s797_s20 = smov 0   ;;  %s799_s21 = smov 0  }
   0x5 LB: > { %s814_s22 = sadd.s32 4294967295, %s747_s21   ;;  %s536_s23 = sadd.s32 4294967294, %s747_s21   ;;  %s747_s21 = sphi %s799_s21, %s997_s21   ;;  %s743_s20 = sphi %s797_s20, %s996_s20   ;;  %s739_s19 = sphi %s795_s19, %s995_s19   ;;  %s735_s18 = sphi %s793_s18, %s994_s18  }
   0x6   : > { %s818_s24 = sadd.s32 1, %s747_s21   ;;  %s28_s25 = sadd.s32 1, %s743_s20 }
   0x7   : > { %s25_s26 = ssub.s32 %s747_s21, %s818_s24  ;;  %p35_p0 = scmp.ne.s32.totalorder %s743_s20, %s739_s19 }
   0x8   : > { %p26_p1 = scmp.eq.s32.totalorder %s25_s26, 0  ;;  %p36_p2 = scmp.eq.s32.totalorder %s747_s21, 0 }
   0x9   : > { %p41_p3 = scmp.ne.s32.totalorder %s739_s19, %s735_s18  ;;  %p42_p4 = scmp.eq.s32.totalorder %s814_s22, 0 }
   0xa   : > { %s830_s27 = scalar_select %p26_p1, %s743_s20, %s28_s25  }
   0xb   : > { %p832_p5 = por %p36_p2, %p35_p0  ;;  %p836_p6 = por %p42_p4, %p41_p3 }
   0xc   : > { %p149_p7 = scmp.eq.s32.totalorder %s814_s22, 1  ;;  %p155_p8 = scmp.eq.s32.totalorder %s536_s23, 1 }
   0xd   : > { %p584_p10 = scmp.lt.s32.totalorder %s747_s21, 2  ;;  %s187_s7 = sand.u32 1, %s743_s20  }
   0xe   : > { %p843_p11 = por %p149_p7, %p35_p0  ;;  %p847_p12 = por %p155_p8, %p41_p3 }
   0xf   : > { %s556_s8 = sshll.u32 %s747_s21, 7  ;;  %s539_s9 = sshll.u32 %s187_s7, 3 }
  0x10   : > { %s986_s30 = scalar_select %p843_p11, 1, 0 }
  0x11   : > { %s987_s6 = scalar_select %p847_p12, 1, 0 }
  0x12   : > { %s856_s12 = scalar_lea.hbm %s977_s0, %s556_s8  ;;  %s191_s13 = scalar_lea.vmem [#allocation2], %s539_s9 }
  0x13   : > { %s199_s14 = sshll.u32 %s191_s13, 4  ;;  %p860_p13 = pnand %p584_p10, %p832_p5  ;;  %s864_s14 = int_to_ptr.vmem [resolvable:$true] %s199_s14 }
  0x14   : > { %s188_s16 = scalar_lea.sflag [#allocation3], %s187_s7  ;;  %s643_s17 = scalar_lea.hbm %s856_s12, 128 }
  0x15   : > { %p644_p2 = scmp.ne.s32.totalorder %s856_s12, %s643_s17  ;;  %p645_p3 = pneg %p860_p13 }
  0x16   : > { %s648_s26 = scalar_lea.hbm %s977_s0, 256  ;;  %p649_p5 = scmp.lt.u32.totalorder %s856_s12, %s977_s0 }
  0x17   : > { %p646_p4 = pnand %p645_p3, %p644_p2  ;;  %p650_p8 = scmp.lt.u32.totalorder %s648_s26, %s643_s17 }
  0x18   : > { %p652_p9 = scmp.lt.u32.totalorder %s643_s17, %s856_s12 }
  0x19   : > { %p647_p7 = pneg %p646_p4  ;;  %p651_p10 = por %p650_p8, %p649_p5 }
  0x1b   : > { %p653_p0 = por %p652_p9, %p651_p10 }
  0x1d   : > { %p654_p1 = pnand %p653_p0, %p647_p7 }
  0x1f   : > { %657 = shalt.err (!%p654_p1)
}
  0x20   : > { %s658_s7 = scalar_lea.vmem %s864_s14, 128  ;;  %s757_s9 = smov [#allocation2]  }
  0x21   : > { %p659_p2 = scmp.ne.s32.totalorder %s864_s14, %s658_s7  ;;  %s663_s10 = sshll.u32 %s757_s9, 4  ;;  %s664_s10 = int_to_ptr.vmem [resolvable:$false] %s663_s10 }
  0x22   : > { %s665_s11 = scalar_lea.vmem %s664_s10, 256  ;;  %p666_p11 = scmp.lt.s32.totalorder %s864_s14, %s664_s10 }
  0x23   : > { %p661_p4 = pnand %p659_p2, %p645_p3  ;;  %p667_p5 = scmp.lt.s32.totalorder %s665_s11, %s658_s7 }
  0x25   : > { %p662_p12 = pneg %p661_p4  ;;  %p668_p8 = por %p667_p5, %p666_p11 }
  0x27   : > { %p669_p9 = pnand %p668_p8, %p662_p12 }
  0x29   : > { %672 = shalt.err (!%p669_p9)
}
  0x2a   : > { %579 = dma.hbm_to_vmem [thread:$0]  (!%p860_p13), %s856_s12, 128, %s864_s14, %s188_s16  }
  0x2b   : > { %p989_p0 = scmp.lt.s32.totalorder %s747_s21, 3  ;;  %p990_p1 = scmp.ge.s32.totalorder %s747_s21, 1 }
  0x2d   : > { %p205_p3 = pnand %p990_p1, %p989_p0 }
  0x2e   : > { %s898_s13 = sand.u32 (!%p205_p3), 1, %s739_s19  }
  0x2f   : > { %208 = sbr.rel (%p205_p3) target bundleno = 815 (0x32f), region = 40  ;;  %s543_s17 = sshll.u32 (!%p205_p3), %s898_s13, 3 }
  0x30   : > { %s211_s23 = scalar_lea.sflag (!%p205_p3), [#allocation3], %s898_s13  ;;  %s902_s25 = scalar_lea.vmem (!%p205_p3), [#allocation2], %s543_s17 }
  0x36   : > { %726 = dma.done.wait (%p836_p6), %s211_s23, 128  }
  0x37   : > { %728 = vsyncadd (%p836_p6), %s211_s23, 4294967168  ;;  %s908_s12 = scalar_lea.vmem [#allocation5], %s543_s17  ;;  %v749_v0 = vmov 0.0   ;;  %s753_s14 = smov 0  }
  0x38 LB: >> { %s545_s15 = sshll.u32 %s755_s14, 7  ;;  %s246_s14 = sadd.s32 1, %s755_s14   ;;  %s755_s14 = sphi %s753_s14, %s246_s14   ;;  %v751_v0 = vphi %v749_v0, %v750_v0  }
  0x39   : >> { %s249_s16 = sshra.s32 %s545_s15, 7  ;;  %p243_p11 = scmp.ge.s32.totalorder %s246_s14, 2  }
  0x3a   : >> { %s546_s26 = sshll.u32 %s249_s16, 2  ;;  %vm255_vm0 = vcmask (%p243_p11), 1043456   ;;  %v758_v4 = vmov (%p243_p11), 0.0   ;;  %vm759_vm1 = vmmov (%p243_p11), 0   ;;  %v260_v7 = vld [vmem:[%s978_s1] sm:$0xf] (%p243_p11)  ;;  %v434_v27 = vlaneseq (%p243_p11) }
  0x3b   : >> { %s252_s28 = scalar_lea.vmem %s902_s25, %s546_s26 [#allocation2]  ;;  %245 = sbr.rel (!%p243_p11) target bundleno = 56 (0x38), region = 93  ;;  %562 = vmatprep.subr.mxu0 (%p243_p11), %v758_v4  ;;  %567 = vmatprep.subr.mxu1 (%p243_p11), %v758_v4  ;;  %vm262_vm2 = vcmask (%p243_p11), 31744   ;;  %v261_v8 = vld [vmem:[%s979_s2] sm:$0xf] (%p243_p11)  ;;  %v760_v15 = vmov (%p243_p11), 0  }
  0x3c   : >> { %v253_v1 = vld [vmem:[%s252_s28] sm:$0xf]  ;;  %564 = vmatprep.mubr.msk.f32.mxu0 (%p243_p11), %vm759_vm1, %v758_v4  ;;  %569 = vmatprep.mubr.msk.f32.mxu1 (%p243_p11), %vm759_vm1, %v758_v4  ;;  %v761_v25 = vmov (%p243_p11), 839922192   ;;  %v435_v29 = vshrl.u32 (%p243_p11), %v434_v27, 7  ;;  %s557_s14 = sshll.u32 (%p243_p11), %s814_s22, 7 }
  0x3d   : >> { %v254_v2 = vadd.f32 %v751_v0, %v253_v1   ;;  %v342_v13 = vld [vmem:[%s980_s3] sm:$0xf] (%p243_p11)  ;;  %638 = vset.pattern.permute.xlu0 (%p243_p11), %v760_v15  ;;  %v432_v26 = vunpack.c.l.s4 (%p243_p11), %v761_v25  ;;  %s456_s15 = sshll.u32 (%p243_p11), %s908_s12, 4  ;;  %s932_s28 = scalar_lea.hbm (%p243_p11), %s982_s5, %s557_s14  ;;  %s934_s15 = int_to_ptr.vmem [resolvable:$true] %s456_s15 }
  0x3e   : > { %v343_v16 = vld [vmem:[%s981_s4] sm:$0xf] (%p243_p11)  ;;  %s442_s29 = scalar_lea.sflag (%p243_p11), [#allocation4], %s898_s13  ;;  %s673_s8 = scalar_lea.vmem (%p243_p11), %s934_s15, 128 }
  0x3f   : >> { %v750_v0 = vmov %v254_v2   ;;  %v256_v3 = vsel (%p243_p11), %vm255_vm0, %v254_v2, 0.0  ;;  %v433_v28 = vunpack.c.0.s8 (%p243_p11), %v432_v26  ;;  %v426_v31 = vld [vmem:[%s902_s25] sm:$0xff] (%p243_p11)  ;;  %p674_p6 = scmp.ne.s32.totalorder (%p243_p11), %s934_s15, %s673_s8  ;;  %p991_p12 = scmp.ne.s32.totalorder (%p243_p11), %s986_s30, 0 }
  0x40   : > { %257 = vadd.xlane.f32.xlu0 (%p243_p11), %v256_v3  ;;  %s762_s22 = smov (%p243_p11), [#allocation5]  }
  0x41   : > { %v436_v30 = vsub.s32 (%p243_p11), %v433_v28, %v435_v29  ;;  %p675_p13 = pnand (%p243_p11), %p674_p6, %p991_p12  ;;  %s677_s25 = sshll.u32 (%p243_p11), %s762_s22, 4  ;;  %s678_s25 = int_to_ptr.vmem [resolvable:$false] %s677_s25 }
  0x42   : > { %s679_s7 = scalar_lea.vmem %s678_s25, 256  ;;  %p680_p10 = scmp.lt.s32.totalorder %s934_s15, %s678_s25 }
  0x43   : > { %p676_p7 = pneg %p675_p13  ;;  %p681_p2 = scmp.lt.s32.totalorder %s679_s7, %s673_s8 }
  0x45   : > { %p682_p4 = por %p681_p2, %p680_p10 }
  0x47   : > { %p683_p5 = pnand %p682_p4, %p676_p7 }
  0xcd   : > { %v258_v5 = vpop.xlane.xlu0 %257 }
  0xce   : > { %v259_v6 = vmul.f32 0.00390625, %v258_v5 }
  0xd0   : > { %563 = vmatpush3.msk.msra.mxu0 %vm255_vm0, %v259_v6 }
  0xd1   : > { %565 = vmatmul.mubr.msk.f32.vlgmr.msra.gmra.mrb[0].mxu0 %vm262_vm2, %v260_v7 }
 0x1a4   : > { %v335_v9 = vpop.f32.mrb[0].mxu0 }
 0x1a5   : > { %v336_v10 = vadd.f32 %v335_v9, %v261_v8  ;;  %v566_v11 = vpop.f32.mrb[1].mxu0 }
 0x1a7   : > { %v340_v12 = vmul.f32 0.1, %v336_v10  ;;  %vm339_vm3 = vcmp.gt.f32.partialorder %v336_v10, 0.0 }
 0x1a9   : > { %v341_v14 = vsel %vm339_vm3, %v336_v10, %v340_v12 }
 0x1aa   : > { %568 = vmatpush3.msk.msra.mxu1 %vm255_vm0, %v341_v14 }
 0x1ab   : > { %570 = vmatmul.mubr.msk.f32.vlgmr.msra.gmra.mrb[0].mxu1 %vm262_vm2, %v342_v13 }
 0x27e   : > { %v416_v17 = vpop.f32.mrb[0].mxu1 }
 0x27f   : > { %v417_v18 = vadd.f32 %v416_v17, %v343_v16  ;;  %v571_v19 = vpop.f32.mrb[1].mxu1 }
 0x281   : > { %v420_v20 = vsub.f32 0.0, %v417_v18 }
 0x283   : > { %v421_v21 = vmul.f32 1.442695, %v420_v20 }
 0x285   : > { %639 = vpow2.f32 %v421_v21 }
 0x28f   : > { %v640_v22 = vpop.eup %639 }
 0x290   : > { %v423_v23 = vadd.f32 1.0, %v640_v22 }
 0x292   : > { %641 = vrcp.f32 %v423_v23 }
 0x29c   : > { %v642_v24 = vpop.eup %641 }
 0x29d   : > { %429 = vperm.xlu0 %638, %v642_v24  }
 0x31c   : > { %v430_v32 = vpop.permute.xlu0 %429 }
 0x31d   : > { %v437_v33 = vrot.slane %v430_v32, %v436_v30 }
 0x31f   : > { %v439_v34 = vmul.f32 %v437_v33, %v426_v31 }
 0x321   : > { %440 = vst [vmem:[%s908_s12] sm:$0xff] %v439_v34 }
 0x322   : > { %686 = shalt.err (!%p683_p5)
}
 0x323   : > { %s687_s13 = scalar_lea.hbm %s932_s28, 128  ;;  %s691_s10 = scalar_lea.hbm %s982_s5, 256 }
 0x324   : > { %p688_p8 = scmp.ne.s32.totalorder %s932_s28, %s687_s13  ;;  %p692_p1 = scmp.lt.u32.totalorder %s932_s28, %s982_s5 }
 0x325   : > { %p693_p3 = scmp.lt.u32.totalorder %s691_s10, %s687_s13  ;;  %p695_p6 = scmp.lt.u32.totalorder %s687_s13, %s932_s28 }
 0x326   : > { %p689_p9 = pnand %p688_p8, %p991_p12 }
 0x327   : > { %p694_p11 = por %p693_p3, %p692_p1 }
 0x328   : > { %p690_p0 = pneg %p689_p9 }
 0x329   : > { %p696_p13 = por %p695_p6, %p694_p11 }
 0x32b   : > { %p697_p7 = pnand %p696_p13, %p690_p0 }
 0x32d   : > { %700 = shalt.err (!%p697_p7)
}
 0x32e   : > { %574 = dma.vmem_to_hbm [thread:$0]  (%p991_p12), %s934_s15, 128, %s932_s28, %s442_s29  }
 0x32f PF: > { %s468_s23 = sand.u32 1, %s735_s18   ;;  %p992_p10 = scmp.ne.s32.totalorder %s987_s6, 0 }
 0x330   : > { %p993_p2 = scmp.ge.s32.totalorder %s747_s21, 2  ;;  %s469_s14 = scalar_lea.sflag [#allocation4], %s468_s23 }
 0x332   : > { %p581_p4 = pnand %p993_p2, %p992_p10 }
 0x334   : > { %730 = dma.done.wait (!%p581_p4), %s469_s14, 128  }
 0x335   : > { %732 = vsyncadd (!%p581_p4), %s469_s14, 4294967168  ;;  %p18_p5 = scmp.ge.s32.totalorder %s818_s24, 4   ;;  %s994_s18 = smov %s739_s19 }
 0x336   : > { %s995_s19 = smov %s743_s20  ;;  %s996_s20 = smov %s830_s27 }
 0x337   : > { %s997_s21 = smov %s818_s24  ;;  %20 = sbr.rel (!%p18_p5) target bundleno = 5 (0x5), region = 104 }
 0x33e   :  { %474 = vsyncpa [#allocation3], 1 }
 0x33f   :  { %476 = vsyncpa [#allocation3 + $0x1], 1 }
 0x340   :  { %477 = vsyncpa [#allocation4], 1 }
 0x341   :  { %479 = vsyncpa [#allocation4 + $0x1], 1 }

</bundles_post_ra>
